<compile_context>
chip_gen: v6e
topology: v6e:2x2x1
jax: 0.10.0
libtpu: 0.0.40
codegen_flags: <defaults>
</compile_context>

<pallas_src>
from functools import partial

import jax
import jax.numpy as jnp
from jax.experimental import pallas as pl
from jax.experimental.pallas import tpu as pltpu

_LANE = 128


def _round_up(x, m):
    return ((x + m - 1) // m) * m


def _cdiv(a, b):
    return -(-a // b)


def _edgeconv_kernel(xij_ref, w_ref, b_ref, out_ref, *, sub):
    # xij_ref: (1, K, TN, 2C)   bf16   [x_i | x_j] along channels
    # w_ref:   (2C, Cout_pad)   bf16   [[W1 - W2]^T ; [W2]^T]
    # b_ref:   (1, Cout_pad)    f32
    # out_ref: (1, TN, Cout_pad) bf16
    k_total = xij_ref.shape[1]
    tn = xij_ref.shape[2]
    cop = b_ref.shape[1]
    n_sub = tn // sub

    b = b_ref[...]                                    # (1, cop), broadcasts

    @pl.loop(0, n_sub)
    def _(s):
        row0 = pl.multiple_of(s * sub, 8)
        # Running max over K, kept in vregs ((sub, cop) f32, sub <= 128).
        acc = jnp.full((sub, cop), -jnp.inf, dtype=jnp.float32)
        # K is a small static constant (e.g. 8-9 neighbors): unroll at trace time.
        for k in range(k_total):
            y = jnp.dot(xij_ref[0, k, pl.ds(row0, sub), :], w_ref[...],
                        preferred_element_type=jnp.float32)
            acc = jnp.maximum(acc, y)
        # Bias + ReLU hoisted out of the K loop (monotone, commutes with max).
        out_ref[0, pl.ds(row0, sub), :] = jnp.maximum(acc + b, 0.0).astype(out_ref.dtype)


def _vmem_params():
    """(per-step block budget, vmem_limit_bytes) sized per TPU generation."""
    try:
        phys = int(pltpu.get_tpu_info().vmem_capacity_bytes)
    except Exception:
        phys = 64 << 20                               # conservative (v7x-sized) fallback
    if phys >= (100 << 20):                           # v5e / v6e: 128 MiB VMEM
        return 56 << 20, 100 << 20
    return 22 << 20, 44 << 20                         # v7x: 64 MiB physical VMEM


def _plan_tiles(N, B, K, C2, cop, budget_bytes):
    """Pick (TN, n_tiles, sub): TN sized against the VMEM budget, cdiv grid
    with N padded to a TN multiple, >=2 grid steps when B == 1 (v7x 2 TCs),
    sub = rows of the vreg-resident accumulator (divides TN)."""
    per_row = 2 * K * C2 * 2 + 2 * cop * 2            # 2-buffered bf16 in + bf16 out, per row
    fixed = 2 * (C2 * cop * 2) + 2 * cop * 4 + 128 * cop * 4   # weights + bias + acc scratch
    tn_max = (budget_bytes - fixed) // max(per_row, 1)
    tn_max = max(8, min(tn_max, 2048, _round_up(N, 8)))
    if B == 1 and N > 8:
        # guarantee >= 2 grid steps so both v7x TensorCores get work
        tn_max = min(tn_max, max(8, _round_up(_cdiv(N, 2), 8)))
    tn_max = max(8, (tn_max // 8) * 8)
    sub = min(128, tn_max)
    tn_max = (tn_max // sub) * sub
    n_tiles = _cdiv(N, tn_max)
    tn = _round_up(_cdiv(N, n_tiles), sub)
    return tn, n_tiles, sub


def edge_conv2d_diff(x_i, x_j, weight, bias):
    """x_i, x_j: (B, C, N, K) NCHW. weight: (Cout, 2C). bias: (Cout,).
    Returns (B, Cout, N, 1), matching the PyTorch module."""
    B, C, N, K = x_i.shape
    Cout = weight.shape[0]
    C2 = 2 * C
    cop = _round_up(Cout, _LANE)                      # lane-dense output width

    budget, vmem_limit = _vmem_params()
    TN, n_tiles, SUB = _plan_tiles(N, B, K, C2, cop, budget)
    N_pad = TN * n_tiles

    # NCHW -> (B, K, N, 2C) bf16.  cast + transpose + concat + pad fuse into a
    # single XLA pass feeding the kernel.
    xi = jnp.transpose(x_i, (0, 3, 2, 1))
    xj = jnp.transpose(x_j, (0, 3, 2, 1))
    xij = jnp.concatenate([xi, xj], axis=-1).astype(jnp.bfloat16)
    if N_pad != N:
        xij = jnp.pad(xij, ((0, 0), (0, 0), (0, N_pad - N), (0, 0)))

    # Fold the (x_j - x_i) difference into the weights:
    #   y = x_i @ (W1 - W2)^T + x_j @ W2^T  ==  [x_i | x_j] @ [[W1-W2]^T ; W2^T]
    w_f32 = weight.astype(jnp.float32)
    w1 = w_f32[:, :C]                                 # acts on x_i
    w2 = w_f32[:, C:]                                 # acts on (x_j - x_i)
    w_eff = jnp.concatenate([jnp.transpose(w1 - w2), jnp.transpose(w2)], axis=0)
    w_eff = jnp.pad(w_eff, ((0, 0), (0, cop - Cout))).astype(jnp.bfloat16)
    b = jnp.pad(bias.astype(jnp.float32), (0, cop - Cout)).reshape(1, cop)

    grid = (B, n_tiles)

    cost = pl.CostEstimate(
        flops=2 * B * N_pad * K * C2 * cop,
        transcendentals=0,
        bytes_accessed=(B * K * N_pad * C2 * 2        # xij   (bf16)
                        + C2 * cop * 2                # W_eff (bf16)
                        + cop * 4                     # bias  (f32)
                        + B * N_pad * cop * 2),       # out   (bf16)
    )

    out = pl.pallas_call(
        partial(_edgeconv_kernel, sub=SUB),
        out_shape=jax.ShapeDtypeStruct((B, N_pad, cop), jnp.bfloat16),
        grid_spec=pltpu.PrefetchScalarGridSpec(
            num_scalar_prefetch=0,
            grid=grid,
            in_specs=[
                pl.BlockSpec((1, K, TN, C2), lambda b_, n_: (b_, 0, n_, 0)),
                pl.BlockSpec((C2, cop), lambda b_, n_: (0, 0)),
                pl.BlockSpec((1, cop), lambda b_, n_: (0, 0)),
            ],
            out_specs=pl.BlockSpec((1, TN, cop), lambda b_, n_: (b_, n_, 0)),
        ),
        compiler_params=pltpu.CompilerParams(
            dimension_semantics=("parallel", "parallel"),
            vmem_limit_bytes=vmem_limit,
        ),
        cost_estimate=cost,
    )(xij, w_eff, b)

    # (B, N_pad, cop) -> slice pad rows/lanes -> (B, Cout, N, 1) in f32.
    out = out[:, :N, :Cout].astype(x_i.dtype)
    return jnp.transpose(out, (0, 2, 1))[..., None]


def edge_conv2d_diff_ref(x_i, x_j, weight, bias):
    """Pure-JAX f32 reference mirroring the PyTorch forward."""
    feat = jnp.concatenate([x_i, x_j - x_i], axis=1)            # (B, 2C, N, K)
    y = jnp.einsum('bcnk,oc->bonk', feat, weight) + bias[None, :, None, None]
    y = jnp.maximum(y, 0.0)
    return jnp.max(y, axis=-1, keepdims=True)                   # (B, Cout, N, 1)


if __name__ == "__main__":
    B, C, N, K = 2, 4, 16, 8
    Cout = 8

    key = jax.random.PRNGKey(0)
    k1, k2, k3, k4 = jax.random.split(key, 4)
    x_i = jax.random.normal(k1, (B, C, N, K), dtype=jnp.float32)
    x_j = jax.random.normal(k2, (B, C, N, K), dtype=jnp.float32)
    # Conv2d(2C, Cout, 1, bias=True): weight (Cout, 2C, 1, 1) squeezed -> (Cout, 2C)
    weight = jax.random.normal(k3, (Cout, 2 * C), dtype=jnp.float32) * 0.1
    bias = jax.random.normal(k4, (Cout,), dtype=jnp.float32) * 0.1

    out = edge_conv2d_diff(x_i, x_j, weight, bias)
    out = jax.block_until_ready(out)

    ref = edge_conv2d_diff_ref(x_i, x_j, weight, bias)
    assert out.shape == (B, Cout, N, 1), out.shape
    # bf16 activations/weights/output with f32 accumulation -> loosened tolerance.
    assert jnp.allclose(out, ref, atol=3e-2, rtol=3e-2), (
        "mismatch vs reference, max abs err = "
        f"{float(jnp.max(jnp.abs(out - ref)))}")

    print("KERNEL_OK")
</pallas_src>

<mosaic_0001>
module attributes {stable_mosaic.version = 11 : i64} {
  func.func @_edgeconv_kernel(%arg0: i32, %arg1: i32, %arg2: memref<1x8x16x8xbf16, #tpu.memory_space<vmem>>, %arg3: memref<8x128xbf16, #tpu.memory_space<vmem>>, %arg4: memref<1x128xf32, #tpu.memory_space<vmem>>, %arg5: memref<1x16x128xbf16, #tpu.memory_space<vmem>>) attributes {dimension_semantics = [#tpu.dimension_semantics<parallel>, #tpu.dimension_semantics<parallel>], iteration_bounds = array<i64: 2, 1>, scalar_prefetch = 0 : i64, scratch_operands = 0 : i64, tpu.core_type = #tpu.core_type<tc>, window_params = [{transform_indices = @transform_0, window_bounds = array<i64: 1, 8, 16, 8>}, {pipeline_mode = #tpu.pipeline_mode<synchronous>, transform_indices = @transform_1, window_bounds = array<i64: 8, 128>}, {pipeline_mode = #tpu.pipeline_mode<synchronous>, transform_indices = @transform_2, window_bounds = array<i64: 1, 128>}, {transform_indices = @transform_3, window_bounds = array<i64: 1, 16, 128>}]} {
    %c0 = arith.constant 0 : index
    %c0_0 = arith.constant 0 : index
    %0 = vector.load %arg4[%c0, %c0_0] : memref<1x128xf32, #tpu.memory_space<vmem>>, vector<1x128xf32>
    %c0_i32 = arith.constant 0 : i32
    %c1_i32 = arith.constant 1 : i32
    %1 = arith.muli %c0_i32, %c1_i32 : i32
    %c0_i32_1 = arith.constant 0 : i32
    %2 = arith.addi %c0_i32_1, %1 : i32
    %c16_i32 = arith.constant 16 : i32
    %3 = arith.muli %2, %c16_i32 : i32
    %4 = tpu.assume_multiple %3, 8 : i32
    %cst = arith.constant 0xFF800000 : f32
    %5 = vector.broadcast %cst : f32 to vector<16x128xf32>
    %c0_2 = arith.constant 0 : index
    %c0_3 = arith.constant 0 : index
    %6 = arith.index_cast %4 : i32 to index
    %c0_4 = arith.constant 0 : index
    %7 = vector.load %arg2[%c0_2, %c0_3, %6, %c0_4] : memref<1x8x16x8xbf16, #tpu.memory_space<vmem>>, vector<1x1x16x8xbf16>
    %8 = vector.shape_cast %7 : vector<1x1x16x8xbf16> to vector<16x8xbf16>
    %c0_5 = arith.constant 0 : index
    %c0_6 = arith.constant 0 : index
    %9 = vector.load %arg3[%c0_5, %c0_6] : memref<8x128xbf16, #tpu.memory_space<vmem>>, vector<8x128xbf16>
    %cst_7 = arith.constant dense<0.000000e+00> : vector<16x128xf32>
    %10 = tpu.matmul %8, %9, %cst_7 {dimension_numbers = #tpu.dot_dimension_numbers<[1], [0], [0], [1], [0, 0, 1, 1], [], []>} : vector<16x8xbf16>, vector<8x128xbf16>, vector<16x128xf32> -> vector<16x128xf32>
    %11 = arith.maximumf %5, %10 : vector<16x128xf32>
    %c0_8 = arith.constant 0 : index
    %c1 = arith.constant 1 : index
    %12 = arith.index_cast %4 : i32 to index
    %c0_9 = arith.constant 0 : index
    %13 = vector.load %arg2[%c0_8, %c1, %12, %c0_9] : memref<1x8x16x8xbf16, #tpu.memory_space<vmem>>, vector<1x1x16x8xbf16>
    %14 = vector.shape_cast %13 : vector<1x1x16x8xbf16> to vector<16x8xbf16>
    %c0_10 = arith.constant 0 : index
    %c0_11 = arith.constant 0 : index
    %15 = vector.load %arg3[%c0_10, %c0_11] : memref<8x128xbf16, #tpu.memory_space<vmem>>, vector<8x128xbf16>
    %cst_12 = arith.constant dense<0.000000e+00> : vector<16x128xf32>
    %16 = tpu.matmul %14, %15, %cst_12 {dimension_numbers = #tpu.dot_dimension_numbers<[1], [0], [0], [1], [0, 0, 1, 1], [], []>} : vector<16x8xbf16>, vector<8x128xbf16>, vector<16x128xf32> -> vector<16x128xf32>
    %17 = arith.maximumf %11, %16 : vector<16x128xf32>
    %c0_13 = arith.constant 0 : index
    %c2 = arith.constant 2 : index
    %18 = arith.index_cast %4 : i32 to index
    %c0_14 = arith.constant 0 : index
    %19 = vector.load %arg2[%c0_13, %c2, %18, %c0_14] : memref<1x8x16x8xbf16, #tpu.memory_space<vmem>>, vector<1x1x16x8xbf16>
    %20 = vector.shape_cast %19 : vector<1x1x16x8xbf16> to vector<16x8xbf16>
    %c0_15 = arith.constant 0 : index
    %c0_16 = arith.constant 0 : index
    %21 = vector.load %arg3[%c0_15, %c0_16] : memref<8x128xbf16, #tpu.memory_space<vmem>>, vector<8x128xbf16>
    %cst_17 = arith.constant dense<0.000000e+00> : vector<16x128xf32>
    %22 = tpu.matmul %20, %21, %cst_17 {dimension_numbers = #tpu.dot_dimension_numbers<[1], [0], [0], [1], [0, 0, 1, 1], [], []>} : vector<16x8xbf16>, vector<8x128xbf16>, vector<16x128xf32> -> vector<16x128xf32>
    %23 = arith.maximumf %17, %22 : vector<16x128xf32>
    %c0_18 = arith.constant 0 : index
    %c3 = arith.constant 3 : index
    %24 = arith.index_cast %4 : i32 to index
    %c0_19 = arith.constant 0 : index
    %25 = vector.load %arg2[%c0_18, %c3, %24, %c0_19] : memref<1x8x16x8xbf16, #tpu.memory_space<vmem>>, vector<1x1x16x8xbf16>
    %26 = vector.shape_cast %25 : vector<1x1x16x8xbf16> to vector<16x8xbf16>
    %c0_20 = arith.constant 0 : index
    %c0_21 = arith.constant 0 : index
    %27 = vector.load %arg3[%c0_20, %c0_21] : memref<8x128xbf16, #tpu.memory_space<vmem>>, vector<8x128xbf16>
    %cst_22 = arith.constant dense<0.000000e+00> : vector<16x128xf32>
    %28 = tpu.matmul %26, %27, %cst_22 {dimension_numbers = #tpu.dot_dimension_numbers<[1], [0], [0], [1], [0, 0, 1, 1], [], []>} : vector<16x8xbf16>, vector<8x128xbf16>, vector<16x128xf32> -> vector<16x128xf32>
    %29 = arith.maximumf %23, %28 : vector<16x128xf32>
    %c0_23 = arith.constant 0 : index
    %c4 = arith.constant 4 : index
    %30 = arith.index_cast %4 : i32 to index
    %c0_24 = arith.constant 0 : index
    %31 = vector.load %arg2[%c0_23, %c4, %30, %c0_24] : memref<1x8x16x8xbf16, #tpu.memory_space<vmem>>, vector<1x1x16x8xbf16>
    %32 = vector.shape_cast %31 : vector<1x1x16x8xbf16> to vector<16x8xbf16>
    %c0_25 = arith.constant 0 : index
    %c0_26 = arith.constant 0 : index
    %33 = vector.load %arg3[%c0_25, %c0_26] : memref<8x128xbf16, #tpu.memory_space<vmem>>, vector<8x128xbf16>
    %cst_27 = arith.constant dense<0.000000e+00> : vector<16x128xf32>
    %34 = tpu.matmul %32, %33, %cst_27 {dimension_numbers = #tpu.dot_dimension_numbers<[1], [0], [0], [1], [0, 0, 1, 1], [], []>} : vector<16x8xbf16>, vector<8x128xbf16>, vector<16x128xf32> -> vector<16x128xf32>
    %35 = arith.maximumf %29, %34 : vector<16x128xf32>
    %c0_28 = arith.constant 0 : index
    %c5 = arith.constant 5 : index
    %36 = arith.index_cast %4 : i32 to index
    %c0_29 = arith.constant 0 : index
    %37 = vector.load %arg2[%c0_28, %c5, %36, %c0_29] : memref<1x8x16x8xbf16, #tpu.memory_space<vmem>>, vector<1x1x16x8xbf16>
    %38 = vector.shape_cast %37 : vector<1x1x16x8xbf16> to vector<16x8xbf16>
    %c0_30 = arith.constant 0 : index
    %c0_31 = arith.constant 0 : index
    %39 = vector.load %arg3[%c0_30, %c0_31] : memref<8x128xbf16, #tpu.memory_space<vmem>>, vector<8x128xbf16>
    %cst_32 = arith.constant dense<0.000000e+00> : vector<16x128xf32>
    %40 = tpu.matmul %38, %39, %cst_32 {dimension_numbers = #tpu.dot_dimension_numbers<[1], [0], [0], [1], [0, 0, 1, 1], [], []>} : vector<16x8xbf16>, vector<8x128xbf16>, vector<16x128xf32> -> vector<16x128xf32>
    %41 = arith.maximumf %35, %40 : vector<16x128xf32>
    %c0_33 = arith.constant 0 : index
    %c6 = arith.constant 6 : index
    %42 = arith.index_cast %4 : i32 to index
    %c0_34 = arith.constant 0 : index
    %43 = vector.load %arg2[%c0_33, %c6, %42, %c0_34] : memref<1x8x16x8xbf16, #tpu.memory_space<vmem>>, vector<1x1x16x8xbf16>
    %44 = vector.shape_cast %43 : vector<1x1x16x8xbf16> to vector<16x8xbf16>
    %c0_35 = arith.constant 0 : index
    %c0_36 = arith.constant 0 : index
    %45 = vector.load %arg3[%c0_35, %c0_36] : memref<8x128xbf16, #tpu.memory_space<vmem>>, vector<8x128xbf16>
    %cst_37 = arith.constant dense<0.000000e+00> : vector<16x128xf32>
    %46 = tpu.matmul %44, %45, %cst_37 {dimension_numbers = #tpu.dot_dimension_numbers<[1], [0], [0], [1], [0, 0, 1, 1], [], []>} : vector<16x8xbf16>, vector<8x128xbf16>, vector<16x128xf32> -> vector<16x128xf32>
    %47 = arith.maximumf %41, %46 : vector<16x128xf32>
    %c0_38 = arith.constant 0 : index
    %c7 = arith.constant 7 : index
    %48 = arith.index_cast %4 : i32 to index
    %c0_39 = arith.constant 0 : index
    %49 = vector.load %arg2[%c0_38, %c7, %48, %c0_39] : memref<1x8x16x8xbf16, #tpu.memory_space<vmem>>, vector<1x1x16x8xbf16>
    %50 = vector.shape_cast %49 : vector<1x1x16x8xbf16> to vector<16x8xbf16>
    %c0_40 = arith.constant 0 : index
    %c0_41 = arith.constant 0 : index
    %51 = vector.load %arg3[%c0_40, %c0_41] : memref<8x128xbf16, #tpu.memory_space<vmem>>, vector<8x128xbf16>
    %cst_42 = arith.constant dense<0.000000e+00> : vector<16x128xf32>
    %52 = tpu.matmul %50, %51, %cst_42 {dimension_numbers = #tpu.dot_dimension_numbers<[1], [0], [0], [1], [0, 0, 1, 1], [], []>} : vector<16x8xbf16>, vector<8x128xbf16>, vector<16x128xf32> -> vector<16x128xf32>
    %53 = arith.maximumf %47, %52 : vector<16x128xf32>
    %54 = vector.broadcast %0 : vector<1x128xf32> to vector<16x128xf32>
    %55 = arith.addf %53, %54 : vector<16x128xf32>
    %cst_43 = arith.constant 0.000000e+00 : f32
    %56 = vector.broadcast %cst_43 : f32 to vector<16x128xf32>
    %57 = arith.maximumf %55, %56 : vector<16x128xf32>
    %58 = arith.truncf %57 : vector<16x128xf32> to vector<16x128xbf16>
    %c0_44 = arith.constant 0 : index
    %59 = arith.index_cast %4 : i32 to index
    %c0_45 = arith.constant 0 : index
    %60 = vector.load %arg5[%c0_44, %59, %c0_45] : memref<1x16x128xbf16, #tpu.memory_space<vmem>>, vector<1x16x128xbf16>
    %61 = vector.shape_cast %60 : vector<1x16x128xbf16> to vector<16x128xbf16>
    %62 = vector.shape_cast %58 : vector<16x128xbf16> to vector<1x16x128xbf16>
    tpu.vector_store %arg5[%c0_44, %59, %c0_45], %62 {strides = array<i32>} : memref<1x16x128xbf16, #tpu.memory_space<vmem>>, vector<1x16x128xbf16>,
    %c1_i32_46 = arith.constant 1 : i32
    return
  }
  func.func @transform_0(%arg0: i32, %arg1: i32) -> (i32, i32, i32, i32) {
    %c0_i32 = arith.constant 0 : i32
    %c0_i32_0 = arith.constant 0 : i32
    %c0_i32_1 = arith.constant 0 : i32
    return %arg0, %c0_i32, %arg1, %c0_i32_0 : i32, i32, i32, i32
  }
  func.func @transform_1(%arg0: i32, %arg1: i32) -> (i32, i32) {
    %c0_i32 = arith.constant 0 : i32
    %c0_i32_0 = arith.constant 0 : i32
    %c0_i32_1 = arith.constant 0 : i32
    return %c0_i32, %c0_i32_0 : i32, i32
  }
  func.func @transform_2(%arg0: i32, %arg1: i32) -> (i32, i32) {
    %c0_i32 = arith.constant 0 : i32
    %c0_i32_0 = arith.constant 0 : i32
    %c0_i32_1 = arith.constant 0 : i32
    return %c0_i32, %c0_i32_0 : i32, i32
  }
  func.func @transform_3(%arg0: i32, %arg1: i32) -> (i32, i32, i32) {
    %c0_i32 = arith.constant 0 : i32
    %c0_i32_0 = arith.constant 0 : i32
    return %arg0, %arg1, %c0_i32 : i32, i32, i32
  }
}

</mosaic_0001>

<bundles_post_ra>
// kernel: tpu_custom_call.1
= control target key start
LH: loop header
LB: loop body
LE: loop exit
PB: predicated region body
PF: predicated region fallthrough
CT: control target
= control target key end

     0   :  { %8 = vsyncpa [#allocation3], 0  ;;  %s1208_s0 = inlined_call_operand.vmem [shape: bf16[2,8,16,8], index: 0, kind: input, shape index: {}]   ;;  %s1209_s1 = inlined_call_operand.vmem [shape: bf16[8,128], index: 1, kind: input, shape index: {}]   ;;  %s1210_s2 = inlined_call_operand.vmem [shape: f32[1,128], index: 2, kind: input, shape index: {}]   ;;  %s1211_s3 = inlined_call_operand.hbm [shape: bf16[2,16,128], index: 3, kind: output, shape index: {}]  }
   0x1   :  { %10 = vsyncpa [#allocation3 + $0x1], 0  ;;  %s1062_s12 = smov 0   ;;  %s1064_s13 = smov 0  }
   0x2   :  { %s1066_s14 = smov 0   ;;  %s1068_s15 = smov 0  }
   0x3   :  { %s1070_s16 = smov 0   ;;  %s1072_s17 = smov 0  }
   0x4 LB: > { %s773_s18 = sadd.s32 4294967295, %s1035_s17   ;;  %s774_s19 = sadd.s32 4294967294, %s1035_s17   ;;  %s1035_s17 = sphi %s1072_s17, %s16_s17   ;;  %s1031_s16 = sphi %s1070_s16, %s1218_s16   ;;  %s1027_s15 = sphi %s1068_s15, %s1217_s15   ;;  %s1023_s14 = sphi %s1066_s14, %s1216_s14   ;;  %s1019_s13 = sphi %s1064_s13, %s1215_s13   ;;  %s1015_s12 = sphi %s1062_s12, %s1214_s12  }
   0x5   : > { %s28_s20 = sadd.s32 1, %s1031_s16  ;;  %s107_s21 = sadd.s32 1, %s1023_s14 }
   0x6   : > { %p30_p0 = scmp.ge.s32.totalorder %s28_s20, 2  ;;  %p117_p1 = scmp.ne.s32.totalorder %s1023_s14, %s1019_s13 }
   0x7   : > { %p118_p2 = scmp.eq.s32.totalorder %s773_s18, 1  ;;  %p123_p3 = scmp.ne.s32.totalorder %s1019_s13, %s1015_s12 }
   0x8   : > { %s1220_s20 = smov (%p30_p0, %s28_s20), 0  ;;  %p124_p5 = scmp.eq.s32.totalorder %s774_s19, 1 }
   0x9   : > { %p1102_p4 = por %p118_p2, %p117_p1  ;;  %s102_s23 = ssub.s32 %s1031_s16, %s1220_s20 }
   0xa   : > { %p777_p6 = scmp.ge.s32.totalorder %s1035_s17, 1  ;;  %p105_p7 = scmp.eq.s32.totalorder %s102_s23, 0 }
   0xb   : > { %p1109_p8 = por %p124_p5, %p123_p3  ;;  %p161_p9 = scmp.lt.s32.totalorder %s1035_s17, 3 }
   0xc   : > { %s1115_s25 = scalar_select %p105_p7, %s1023_s14, %s107_s21  }
   0xd   : > { %p162_p10 = pnand %p777_p6, %p161_p9 }
   0xe   : > { %p190_p11 = scmp.lt.s32.totalorder (!%p162_p10), %s1027_s15, 1  ;;  %s186_s6 = sand.u32 (!%p162_p10), 1, %s1019_s13  }
   0xf   : > { %165 = sbr.rel (%p162_p10) target bundleno = 270 (0x10e), region = 32  ;;  %s778_s7 = sshll.u32 (!%p162_p10), %s186_s6, 3 }
  0x10   : > { %s822_s10 = sshll.u32 (!%p162_p10), %s1027_s15, 7  ;;  %s188_s11 = scalar_lea.vmem (!%p162_p10), [#allocation2], %s778_s7 }
  0x11   : > { %s687_s18 = sshll.u32 (!%p162_p10), %s188_s11, 4  ;;  %s1159_s23 = scalar_lea.hbm (!%p162_p10), %s1211_s3, %s822_s10  ;;  %s1161_s18 = int_to_ptr.vmem [resolvable:$true] %s687_s18 }
  0x12   : > { %s1163_s26 = scalar_lea.sflag (!%p162_p10), [#allocation3], %s186_s6  ;;  %s959_s27 = scalar_lea.vmem (!%p162_p10), %s1161_s18, 128 }
  0x13   : > { %p960_p12 = scmp.ne.s32.totalorder (!%p162_p10), %s1161_s18, %s959_s27 }
  0x14   : > { %v204_v0 = vld [vmem:[%s1209_s1] sm:$0xf]  ;;  %vm214_vm0 = vcmask 1043456   ;;  %v1037_v1 = vmov 0.0   ;;  %s191_s28 = scalar_select %p190_p11, %s1027_s15, 1  ;;  %vm1038_vm1 = vmmov 0  }
  0x15   : > { %844 = vmatprep.subr.bf16.mxu0 %v1037_v1  ;;  %v216_v2 = vsel %vm214_vm0, %v204_v0, 0  ;;  %850 = vmatprep.subr.bf16.mxu1 %v1037_v1  ;;  %vm210_vm2 = vcmask 64512   ;;  %v811_v51 = vld [vmem:[%s1210_s2] ss:$0 sm:$0xff]  ;;  %p961_p13 = pnand %p960_p12, %p1102_p4  ;;  %s1039_s15 = smov [#allocation2]  }
  0x16   : > { %845 = vmatpush3.bf16.msra.mxu0 %v216_v2  ;;  %851 = vmatpush3.bf16.msra.mxu1 %v216_v2  ;;  %s819_s29 = sshll.u32 %s191_s28, 6  ;;  %s963_s28 = sshll.u32 %s1039_s15, 4  ;;  %s964_s28 = int_to_ptr.vmem [resolvable:$false] %s963_s28 }
  0x17   : > { %846 = vmatprep.mubr.msk.bf16.mxu0 %vm1038_vm1, %v1037_v1  ;;  %852 = vmatprep.mubr.msk.bf16.mxu1 %vm1038_vm1, %v1037_v1  ;;  %s1127_s5 = scalar_lea.vmem %s1208_s0, %s819_s29  ;;  %p962_p0 = pneg %p961_p13 }
  0x18   : > { %856 = vmatprep.subr.bf16.mxu0 %v1037_v1  ;;  %862 = vmatprep.subr.bf16.mxu1 %v1037_v1  ;;  %v951_v3 = vld [vmem:[%s1127_s5] sm:$0xff]   ;;  %v952_v4 = vld [vmem:[%s1127_s5 + $0x8] sm:$0xff]   ;;  %v953_v5 = vld [vmem:[%s1127_s5 + $0x10] sm:$0xff]   ;;  %s965_s29 = scalar_lea.vmem %s964_s28, 256  ;;  %p966_p1 = scmp.lt.s32.totalorder %s1161_s18, %s964_s28 }
  0x19   : > { %847 = vmatmul.mubr.msk.bf16.vlgmr.msra.gmra.mxu0 %vm210_vm2, %v951_v3  ;;  %853 = vmatmul.mubr.msk.bf16.vlgmr.msra.gmra.mxu1 %vm210_vm2, %v952_v4  ;;  %v954_v6 = vld [vmem:[%s1127_s5 + $0x18] sm:$0xff]   ;;  %v955_v7 = vld [vmem:[%s1127_s5 + $0x20] sm:$0xff]   ;;  %v956_v8 = vld [vmem:[%s1127_s5 + $0x28] sm:$0xff]   ;;  %p967_p2 = scmp.lt.s32.totalorder %s965_s29, %s959_s27 }
  0x1a   : > { %857 = vmatpush3.bf16.msra.mxu0 %v216_v2  ;;  %863 = vmatpush3.bf16.msra.mxu1 %v216_v2  ;;  %v957_v9 = vld [vmem:[%s1127_s5 + $0x30] sm:$0xff]   ;;  %v958_v10 = vld [vmem:[%s1127_s5 + $0x38] sm:$0xff]  }
  0x1b   : > { %858 = vmatprep.mubr.msk.bf16.mxu0 %vm1038_vm1, %v1037_v1  ;;  %864 = vmatprep.mubr.msk.bf16.mxu1 %vm1038_vm1, %v1037_v1  ;;  %p968_p3 = por %p967_p2, %p966_p1 }
  0x1c   : > { %868 = vmatprep.subr.bf16.mxu0 %v1037_v1  ;;  %874 = vmatprep.subr.bf16.mxu1 %v1037_v1 }
  0x1d   : > { %p969_p5 = pnand %p968_p3, %p962_p0 }
  0x21   : > { %859 = vmatmul.mubr.msk.bf16.vlgmr.msra.gmra.mxu0 %vm210_vm2, %v953_v5  ;;  %865 = vmatmul.mubr.msk.bf16.vlgmr.msra.gmra.mxu1 %vm210_vm2, %v954_v6 }
  0x22   : > { %869 = vmatpush3.bf16.msra.mxu0 %v216_v2  ;;  %875 = vmatpush3.bf16.msra.mxu1 %v216_v2 }
  0x23   : > { %870 = vmatprep.mubr.msk.bf16.mxu0 %vm1038_vm1, %v1037_v1  ;;  %876 = vmatprep.mubr.msk.bf16.mxu1 %vm1038_vm1, %v1037_v1 }
  0x24   : > { %880 = vmatprep.subr.bf16.mxu0 %v1037_v1  ;;  %886 = vmatprep.subr.bf16.mxu1 %v1037_v1 }
  0x29   : > { %871 = vmatmul.mubr.msk.bf16.vlgmr.msra.gmra.mxu0 %vm210_vm2, %v955_v7  ;;  %877 = vmatmul.mubr.msk.bf16.vlgmr.msra.gmra.mxu1 %vm210_vm2, %v956_v8 }
  0x2a   : > { %881 = vmatpush3.bf16.msra.mxu0 %v216_v2  ;;  %887 = vmatpush3.bf16.msra.mxu1 %v216_v2 }
  0x2b   : > { %882 = vmatprep.mubr.msk.bf16.mxu0 %vm1038_vm1, %v1037_v1  ;;  %888 = vmatprep.mubr.msk.bf16.mxu1 %vm1038_vm1, %v1037_v1 }
  0x31   : > { %883 = vmatmul.mubr.msk.bf16.vlgmr.msra.gmra.mxu0 %vm210_vm2, %v957_v9  ;;  %889 = vmatmul.mubr.msk.bf16.vlgmr.msra.gmra.mxu1 %vm210_vm2, %v958_v10 }
  0xd9   : > { %v252_v11 = vpop.f32.mrf.mxu0  ;;  %v306_v12 = vpop.f32.mrf.mxu1 }
  0xda   : > { %v313_v22 = vmax.f32 %v252_v11, %v306_v12 }
  0xdb   : > { %v848_v13 = vpop.f32.mrf.mxu0  ;;  %v854_v14 = vpop.f32.mrf.mxu1 }
  0xdd   : > { %v255_v15 = vpop.f32.mrf.mxu0  ;;  %v309_v16 = vpop.f32.mrf.mxu1 }
  0xde   : > { %v314_v28 = vmax.f32 %v255_v15, %v309_v16 }
  0xdf   : > { %v849_v17 = vpop.f32.mrf.mxu0  ;;  %v855_v18 = vpop.f32.mrf.mxu1 }
  0xe1   : > { %v362_v19 = vpop.f32.mrf.mxu0  ;;  %v418_v20 = vpop.f32.mrf.mxu1 }
  0xe2   : > { %v369_v25 = vmax.f32 %v313_v22, %v362_v19 }
  0xe3   : > { %v860_v21 = vpop.f32.mrf.mxu0  ;;  %v866_v23 = vpop.f32.mrf.mxu1 }
  0xe4   : > { %v425_v31 = vmax.f32 %v369_v25, %v418_v20 }
  0xe5   : > { %v365_v24 = vpop.f32.mrf.mxu0  ;;  %v421_v26 = vpop.f32.mrf.mxu1 }
  0xe6   : > { %v370_v32 = vmax.f32 %v314_v28, %v365_v24 }
  0xe7   : > { %v861_v27 = vpop.f32.mrf.mxu0  ;;  %v867_v29 = vpop.f32.mrf.mxu1 }
  0xe8   : > { %v426_v38 = vmax.f32 %v370_v32, %v421_v26 }
  0xe9   : > { %v474_v30 = vpop.f32.mrf.mxu0  ;;  %v530_v33 = vpop.f32.mrf.mxu1 }
  0xea   : > { %v481_v35 = vmax.f32 %v425_v31, %v474_v30 }
  0xeb   : > { %v872_v34 = vpop.f32.mrf.mxu0  ;;  %v878_v36 = vpop.f32.mrf.mxu1 }
  0xec   : > { %v537_v41 = vmax.f32 %v481_v35, %v530_v33 }
  0xed   : > { %v477_v37 = vpop.f32.mrf.mxu0  ;;  %v533_v39 = vpop.f32.mrf.mxu1 }
  0xee   : > { %v482_v42 = vmax.f32 %v426_v38, %v477_v37 }
  0xef   : > { %v873_v40 = vpop.f32.mrf.mxu0  ;;  %v879_v43 = vpop.f32.mrf.mxu1 }
  0xf0   : > { %v538_v48 = vmax.f32 %v482_v42, %v533_v39 }
  0xf1   : > { %v586_v44 = vpop.f32.mrf.mxu0  ;;  %v642_v46 = vpop.f32.mrf.mxu1 }
  0xf2   : > { %v593_v45 = vmax.f32 %v537_v41, %v586_v44 }
  0xf3   : > { %v884_v47 = vpop.f32.mrf.mxu0  ;;  %v890_v50 = vpop.f32.mrf.mxu1 }
  0xf4   : > { %v649_v49 = vmax.f32 %v593_v45, %v642_v46 }
  0xf5   : > { %v589_v52 = vpop.f32.mrf.mxu0  ;;  %v645_v54 = vpop.f32.mrf.mxu1 }
  0xf6   : > { %v594_v53 = vmax.f32 %v538_v48, %v589_v52  ;;  %v657_v56 = vadd.f32 %v811_v51, %v649_v49 }
  0xf7   : > { %v885_v55 = vpop.f32.mrf.mxu0  ;;  %v891_v58 = vpop.f32.mrf.mxu1 }
  0xf8   : > { %v650_v57 = vmax.f32 %v594_v53, %v645_v54  ;;  %v659_v60 = vmax.f32 %v657_v56, 0.0 }
  0xfa   : > { %v658_v59 = vadd.f32 %v811_v51, %v650_v57 }
  0xfc   : > { %v660_v61 = vmax.f32 %v658_v59, 0.0 }
  0xfe   : > { %v826_v62 = vpack.c.bf16 %v660_v61, %v659_v60 }
 0x100   : > { %827 = vst [vmem:[%s188_s11] sm:$0xff] %v826_v62  }
 0x101   : > { %972 = shalt.err (!%p969_p5)
}
 0x102   : > { %s973_s30 = scalar_lea.hbm %s1159_s23, 128  ;;  %s977_s6 = scalar_lea.hbm %s1211_s3, 256 }
 0x103   : > { %p974_p6 = scmp.ne.s32.totalorder %s1159_s23, %s973_s30  ;;  %p978_p10 = scmp.lt.s32.totalorder %s1159_s23, %s1211_s3 }
 0x104   : > { %p979_p11 = scmp.lt.s32.totalorder %s977_s6, %s973_s30 }
 0x105   : > { %p975_p7 = pnand %p974_p6, %p1102_p4 }
 0x106   : > { %p980_p12 = por %p979_p11, %p978_p10 }
 0x107   : > { %p976_p9 = pneg %p975_p7 }
 0x109   : > { %p981_p13 = pnand %p980_p12, %p976_p9 }
 0x10b   : > { %984 = shalt.err (!%p981_p13)
}
 0x10c   : > { %s1040_s9 = smov 64   ;;  %s1041_s10 = smov 4  }
 0x10d   : > { %892 = dma.vmem_to_hbm [thread:$0]  (%p1102_p4), %s1161_s18, 128, %s1159_s23, %s1163_s26, %s1040_s9, %s1040_s9, %s1041_s10  }
 0x10e PF: > { %p898_p0 = scmp.ge.s32.totalorder %s1035_s17, 2  ;;  %s702_s11 = sand.u32 1, %s1015_s12  }
 0x10f   : > { %s703_s19 = scalar_lea.sflag [#allocation3], %s702_s11 }
 0x110   : > { %p895_p1 = pnand %p898_p0, %p1109_p8 }
 0x112   : > { %p896_p2 = pneg %p895_p1 }
 0x114   : > { %1010 = dma.done.wait (%p896_p2), %s703_s19, 128  }
 0x115   : > { %1012 = vsyncadd (%p896_p2), %s703_s19, 4294967168  ;;  %s16_s17 = sadd.s32 1, %s1035_s17   ;;  %s1214_s12 = smov %s1019_s13 }
 0x116   : > { %p13_p3 = scmp.ge.s32.totalorder %s16_s17, 4   ;;  %s1215_s13 = smov %s1023_s14 }
 0x117   : > { %s1216_s14 = smov %s1115_s25  ;;  %s1217_s15 = smov %s1031_s16 }
 0x118   : > { %s1218_s16 = smov %s1220_s20  ;;  %15 = sbr.rel (!%p13_p3) target bundleno = 4 (0x4), region = 74 }
 0x11d   :  { %708 = vsyncpa [#allocation3], 1 }
 0x11e   :  { %710 = vsyncpa [#allocation3 + $0x1], 1 }

</bundles_post_ra>
